<compile_context>
chip_gen: v7x
topology: tpu7x:2x2x1
jax: 0.10.0
libtpu: 0.0.40
codegen_flags: <defaults>
</compile_context>

<pallas_src>
import jax
import jax.numpy as jnp
from jax import lax
from jax.experimental import pallas as pl
from jax.experimental.pallas import tpu as pltpu


def _round_up(a: int, b: int) -> int:
    return -(-a // b) * b


# ----------------------------- kernel bodies -----------------------------


def _resident_kernel(x_ref, w_ref, b_ref, o_ref):
    """W fully resident in VMEM. x_ref/o_ref: (tm, D); w_ref: (D, D) (out, in); b_ref: (1, D)."""
    x = x_ref[...]
    # x @ W.T with W in PyTorch (out, in) layout: contract dim 1 of x with dim 1 of W.
    y = lax.dot_general(
        x, w_ref[...],
        dimension_numbers=(((1,), (1,)), ((), ())),
        preferred_element_type=jnp.float32,
    )
    y = jnp.maximum(y + b_ref[...].astype(jnp.float32), 0.0)   # bias + ReLU on the VPU
    o_ref[...] = (x.astype(jnp.float32) + y).astype(o_ref.dtype)


def _tiled_kernel(x_ref, xr_ref, w_ref, b_ref, o_ref, acc_ref):
    """(M, N, K)-tiled path for large D.

    x_ref : (tm, tk)  x tile for the matmul        (block index (i, k))
    xr_ref: (tm, tn)  x tile for the residual add  (block index (i, j); DMA'd once per (i, j))
    w_ref : (tn, tk)  weight tile, PyTorch layout  (block index (j, k))
    b_ref : (1, tn)   bias tile                    (block index (0, j))
    o_ref : (tm, tn)  output tile (written at the last k step)
    acc_ref: (tm, tn) f32 accumulator scratch
    """
    k = pl.program_id(2)

    @pl.when(k == 0)
    def _():
        # Fold the bias into the accumulator init (saves a separate add pass).
        acc_ref[...] = jnp.broadcast_to(b_ref[...].astype(jnp.float32), acc_ref.shape)

    acc_ref[...] += lax.dot_general(
        x_ref[...], w_ref[...],
        dimension_numbers=(((1,), (1,)), ((), ())),
        preferred_element_type=jnp.float32,
    )

    @pl.when(k == pl.num_programs(2) - 1)
    def _():
        y = jnp.maximum(acc_ref[...], 0.0)
        o_ref[...] = (xr_ref[...].astype(jnp.float32) + y).astype(o_ref.dtype)


# ----------------------------- wrapper -----------------------------


def residual_linear(
    x, w, b, *,
    tm=None,
    tn=None,
    tk=None,
    max_resident_vmem_bytes: int = 40 * 1024 * 1024,
):
    """y = x + relu(x @ w.T + b).  x: [M, D]; w: [D, D] (out, in PyTorch layout); b: [D]."""
    M, D = x.shape
    assert w.shape == (D, D) and b.shape == (D,)
    out_dtype = x.dtype

    xb = jnp.dtype(x.dtype).itemsize
    wb = jnp.dtype(w.dtype).itemsize
    ob = jnp.dtype(out_dtype).itemsize

    # ---- lane-dense feature dim: pad D to a multiple of 128 (no-op for typical D). ----
    D_pad = max(_round_up(D, 128), 128)
    if D_pad != D:
        x = jnp.pad(x, ((0, 0), (0, D_pad - D)))
        w = jnp.pad(w, ((0, D_pad - D), (0, D_pad - D)))
        b = jnp.pad(b, ((0, D_pad - D),))

    # ---- row tiling: auto-size tm (~1 MiB x tile, >=256 rows) unless caller overrides. ----
    if tm is None:
        tm = max(256, (1 << 20) // max(D_pad * xb, 1))
    tm = min(int(tm), 1024)
    tm = max(8, _round_up(min(tm, _round_up(M, 8)), 8))
    M_pad = _round_up(M, tm)
    if M_pad != M:
        x = jnp.pad(x, ((0, M_pad - M), (0, 0)))

    b2 = b.reshape(1, D_pad)

    # Conservative VMEM working set if W is kept fully resident (assume every block
    # is double-buffered by the Pallas pipeline).
    resident_bytes = (
        2 * D_pad * D_pad * wb        # weight
        + 2 * tm * D_pad * xb         # x tiles
        + 2 * tm * D_pad * ob         # o tiles
        + 2 * D_pad * xb              # bias
    )

    if resident_bytes <= max_resident_vmem_bytes:
        # -------- resident-weight path: grid over rows only --------
        grid = (M_pad // tm,)
        grid_spec = pltpu.PrefetchScalarGridSpec(
            num_scalar_prefetch=0,
            grid=grid,
            in_specs=[
                pl.BlockSpec((tm, D_pad), lambda i: (i, 0)),     # x (streamed once)
                pl.BlockSpec((D_pad, D_pad), lambda i: (0, 0)),  # W (constant index -> DMA'd once)
                pl.BlockSpec((1, D_pad), lambda i: (0, 0)),      # bias
            ],
            out_specs=pl.BlockSpec((tm, D_pad), lambda i: (i, 0)),
        )
        kernel = _resident_kernel
        operands = (x, w, b2)
        dim_sem = ("parallel",)
        vmem_est = resident_bytes
    else:
        # -------- (M, N, K)-tiled path: bounded weight working set (fits v7x 64 MiB) --------
        def _pick(requested, candidates):
            if requested is not None:
                assert requested % 128 == 0 and D_pad % requested == 0
                return requested
            for c in candidates:
                if D_pad % c == 0:
                    return c
            return 128

        tn_ = _pick(tn, (256, 128))
        tk_ = _pick(tk, (512, 256, 128))
        grid = (M_pad // tm, D_pad // tn_, D_pad // tk_)
        grid_spec = pltpu.PrefetchScalarGridSpec(
            num_scalar_prefetch=0,
            grid=grid,
            in_specs=[
                pl.BlockSpec((tm, tk_), lambda i, j, k: (i, k)),   # x for the matmul
                pl.BlockSpec((tm, tn_), lambda i, j, k: (i, j)),   # x for the residual
                pl.BlockSpec((tn_, tk_), lambda i, j, k: (j, k)),  # W tile (out, in)
                pl.BlockSpec((1, tn_), lambda i, j, k: (0, j)),    # bias tile
            ],
            out_specs=pl.BlockSpec((tm, tn_), lambda i, j, k: (i, j)),
            scratch_shapes=[pltpu.VMEM((tm, tn_), jnp.float32)],
        )
        kernel = _tiled_kernel
        operands = (x, x, w, b2)
        dim_sem = ("parallel", "parallel", "arbitrary")
        vmem_est = (
            2 * tm * tk_ * xb + 2 * tm * tn_ * xb + 2 * tn_ * tk_ * wb
            + 2 * tn_ * xb + 2 * tm * tn_ * ob + tm * tn_ * 4
        )

    vmem_limit = int(min(max(int(vmem_est * 1.25) + (2 << 20), 16 * 1024 * 1024),
                         64 * 1024 * 1024))

    out = pl.pallas_call(
        kernel,
        out_shape=jax.ShapeDtypeStruct((M_pad, D_pad), out_dtype),
        grid_spec=grid_spec,
        compiler_params=pltpu.CompilerParams(
            dimension_semantics=dim_sem,
            vmem_limit_bytes=vmem_limit,
        ),
    )(*operands)

    if (M_pad, D_pad) != (M, D):
        out = out[:M, :D]
    return out


if __name__ == "__main__":
    key = jax.random.PRNGKey(0)
    keys = jax.random.split(key, 9)

    # --- Test 1: toy shape consistent with the module (seq=8, d_int=32); resident path. ---
    M, D = 8, 32
    x = jax.random.normal(keys[0], (M, D), dtype=jnp.float32)
    bound = 1.0 / jnp.sqrt(D)
    w = jax.random.uniform(keys[1], (D, D), minval=-bound, maxval=bound, dtype=jnp.float32)
    b = jax.random.uniform(keys[2], (D,), minval=-bound, maxval=bound, dtype=jnp.float32)

    out = jax.block_until_ready(residual_linear(x, w, b))
    ref = x + jnp.maximum(x @ w.T + b, 0.0)
    assert out.shape == (M, D)
    assert jnp.allclose(out, ref, atol=1e-5, rtol=1e-5), "mismatch vs reference (resident path)"

    # --- Test 2: ragged M + multi-step pipelined resident path. ---
    M1, D1 = 264, 512
    x1 = jax.random.normal(keys[3], (M1, D1), dtype=jnp.float32)
    bound1 = 1.0 / jnp.sqrt(D1)
    w1 = jax.random.uniform(keys[4], (D1, D1), minval=-bound1, maxval=bound1, dtype=jnp.float32)
    b1 = jax.random.uniform(keys[5], (D1,), minval=-bound1, maxval=bound1, dtype=jnp.float32)

    out1 = jax.block_until_ready(residual_linear(x1, w1, b1))
    ref1 = x1 + jnp.maximum(x1 @ w1.T + b1, 0.0)
    assert out1.shape == (M1, D1)
    assert jnp.allclose(out1, ref1, atol=1e-4, rtol=1e-4), "mismatch vs reference (resident, pipelined)"

    # --- Test 3: exercise the (M, N, K)-tiled path explicitly (still small). ---
    M2, D2 = 136, 256
    x2 = jax.random.normal(keys[6], (M2, D2), dtype=jnp.float32)
    bound2 = 1.0 / jnp.sqrt(D2)
    w2 = jax.random.uniform(keys[7], (D2, D2), minval=-bound2, maxval=bound2, dtype=jnp.float32)
    b2 = jax.random.uniform(keys[8], (D2,), minval=-bound2, maxval=bound2, dtype=jnp.float32)

    out2 = jax.block_until_ready(
        residual_linear(x2, w2, b2, tm=64, tn=128, tk=128, max_resident_vmem_bytes=0)
    )
    ref2 = x2 + jnp.maximum(x2 @ w2.T + b2, 0.0)
    assert out2.shape == (M2, D2)
    assert jnp.allclose(out2, ref2, atol=1e-3, rtol=1e-3), "mismatch vs reference (tiled path)"

    print("KERNEL_OK")
</pallas_src>

<mosaic_0001>
module attributes {stable_mosaic.version = 11 : i64} {
  func.func @_resident_kernel(%arg0: i32, %arg1: memref<8x128xf32, #tpu.memory_space<vmem>>, %arg2: memref<128x128xf32, #tpu.memory_space<vmem>>, %arg3: memref<1x128xf32, #tpu.memory_space<vmem>>, %arg4: memref<8x128xf32, #tpu.memory_space<vmem>>) attributes {dimension_semantics = [#tpu.dimension_semantics<parallel>], iteration_bounds = array<i64: 1>, scalar_prefetch = 0 : i64, scratch_operands = 0 : i64, tpu.core_type = #tpu.core_type<tc>, window_params = [{transform_indices = @transform_0, window_bounds = array<i64: 8, 128>}, {pipeline_mode = #tpu.pipeline_mode<synchronous>, transform_indices = @transform_1, window_bounds = array<i64: 128, 128>}, {pipeline_mode = #tpu.pipeline_mode<synchronous>, transform_indices = @transform_2, window_bounds = array<i64: 1, 128>}, {transform_indices = @transform_3, window_bounds = array<i64: 8, 128>}]} {
    %c0 = arith.constant 0 : index
    %c0_0 = arith.constant 0 : index
    %0 = vector.load %arg1[%c0, %c0_0] : memref<8x128xf32, #tpu.memory_space<vmem>>, vector<8x128xf32>
    %c0_1 = arith.constant 0 : index
    %c0_2 = arith.constant 0 : index
    %1 = vector.load %arg2[%c0_1, %c0_2] : memref<128x128xf32, #tpu.memory_space<vmem>>, vector<128x128xf32>
    %cst = arith.constant dense<0.000000e+00> : vector<8x128xf32>
    %2 = tpu.matmul %0, %1, %cst {dimension_numbers = #tpu.dot_dimension_numbers<[1], [1], [0], [0], [0, 0, 1, 0], [], []>} : vector<8x128xf32>, vector<128x128xf32>, vector<8x128xf32> -> vector<8x128xf32>
    %c0_3 = arith.constant 0 : index
    %c0_4 = arith.constant 0 : index
    %3 = vector.load %arg3[%c0_3, %c0_4] : memref<1x128xf32, #tpu.memory_space<vmem>>, vector<1x128xf32>
    %4 = vector.broadcast %3 : vector<1x128xf32> to vector<8x128xf32>
    %5 = arith.addf %2, %4 : vector<8x128xf32>
    %cst_5 = arith.constant 0.000000e+00 : f32
    %6 = vector.broadcast %cst_5 : f32 to vector<8x128xf32>
    %7 = arith.maximumf %5, %6 : vector<8x128xf32>
    %8 = arith.addf %0, %7 : vector<8x128xf32>
    %c0_6 = arith.constant 0 : index
    %c0_7 = arith.constant 0 : index
    %9 = vector.load %arg4[%c0_6, %c0_7] : memref<8x128xf32, #tpu.memory_space<vmem>>, vector<8x128xf32>
    tpu.vector_store %arg4[%c0_6, %c0_7], %8 {strides = array<i32>} : memref<8x128xf32, #tpu.memory_space<vmem>>, vector<8x128xf32>,
    return
  }
  func.func @transform_0(%arg0: i32) -> (i32, i32) {
    %c0_i32 = arith.constant 0 : i32
    %c0_i32_0 = arith.constant 0 : i32
    return %arg0, %c0_i32 : i32, i32
  }
  func.func @transform_1(%arg0: i32) -> (i32, i32) {
    %c0_i32 = arith.constant 0 : i32
    %c0_i32_0 = arith.constant 0 : i32
    %c0_i32_1 = arith.constant 0 : i32
    return %c0_i32, %c0_i32_0 : i32, i32
  }
  func.func @transform_2(%arg0: i32) -> (i32, i32) {
    %c0_i32 = arith.constant 0 : i32
    %c0_i32_0 = arith.constant 0 : i32
    %c0_i32_1 = arith.constant 0 : i32
    return %c0_i32, %c0_i32_0 : i32, i32
  }
  func.func @transform_3(%arg0: i32) -> (i32, i32) {
    %c0_i32 = arith.constant 0 : i32
    %c0_i32_0 = arith.constant 0 : i32
    return %arg0, %c0_i32 : i32, i32
  }
}

</mosaic_0001>

<bundles_post_ra>
// kernel: tpu_custom_call.1
= control target key start
LH: loop header
LB: loop body
LE: loop exit
PB: predicated region body
PF: predicated region fallthrough
CT: control target
= control target key end

     0   :  { %8 = vsyncpa [#allocation3], 0  ;;  %s385_s0 = inlined_call_operand.hbm [shape: f32[8,128], index: 0, kind: input, shape index: {}]   ;;  %s386_s1 = inlined_call_operand.hbm [shape: f32[128,128], index: 1, kind: input, shape index: {}]   ;;  %s387_s2 = inlined_call_operand.vmem [shape: f32[1,128], index: 2, kind: input, shape index: {}]   ;;  %s388_s3 = inlined_call_operand.hbm [shape: f32[8,128], index: 3, kind: output, shape index: {}]  }
   0x1   :  { %9 = vsyncpa [#allocation6], 0 }
   0x2   :  { %10 = vsyncpa [#allocation4], 0  ;;  %s311_s12 = smov [#allocation2]   ;;  %s312_s14 = smov [#allocation5]  }
   0x3   :  { %s17_s13 = sshll.u32 %s311_s12, 4  ;;  %s26_s15 = sshll.u32 %s312_s14, 4  ;;  %s18_s13 = int_to_ptr.vmem [resolvable:$true] %s17_s13  ;;  %s339_s15 = int_to_ptr.vmem [resolvable:$true] %s26_s15 }
   0x4   :  { %s239_s18 = scalar_lea.hbm %s385_s0, 128 }
   0x5   :  { %p240_p0 = scmp.ne.s32.totalorder %s385_s0, %s239_s18  ;;  %p243_p1 = scmp.lt.u32.totalorder %s239_s18, %s385_s0 }
   0x7   :  { %p245_p2 = pnand %p243_p1, %p240_p0 }
   0x9   :  { %248 = shalt.err (!%p245_p2)
}
   0xa   :  { %s249_s23 = scalar_lea.vmem %s18_s13, 128  ;;  %p254_p4 = scmp.lt.s32.totalorder %s18_s13, %s18_s13 }
   0xb   :  { %p250_p3 = scmp.ne.s32.totalorder %s18_s13, %s249_s23  ;;  %p255_p5 = scmp.lt.s32.totalorder %s249_s23, %s249_s23 }
   0xd   :  { %p256_p6 = por %p255_p5, %p254_p4 }
   0xf   :  { %p257_p7 = pnand %p256_p6, %p250_p3 }
  0x11   :  { %260 = shalt.err (!%p257_p7)
}
  0x12   :  { %20 = dma.hbm_to_vmem [thread:$0]  %s385_s0, 128, %s18_s13, [#allocation3]  }
  0x13   :  { %s261_s28 = scalar_lea.hbm %s386_s1, 2048 }
  0x14   :  { %p262_p8 = scmp.ne.s32.totalorder %s386_s1, %s261_s28  ;;  %p265_p9 = scmp.lt.u32.totalorder %s261_s28, %s386_s1 }
  0x16   :  { %p267_p10 = pnand %p265_p9, %p262_p8 }
  0x18   :  { %270 = shalt.err (!%p267_p10)
}
  0x19   :  { %s271_s6 = scalar_lea.vmem %s339_s15, 2048  ;;  %p276_p12 = scmp.lt.s32.totalorder %s339_s15, %s339_s15 }
  0x1a   :  { %p272_p11 = scmp.ne.s32.totalorder %s339_s15, %s271_s6  ;;  %p277_p13 = scmp.lt.s32.totalorder %s271_s6, %s271_s6 }
  0x1c   :  { %p278_p0 = por %p277_p13, %p276_p12 }
  0x1e   :  { %p279_p1 = pnand %p278_p0, %p272_p11 }
  0x20   :  { %282 = shalt.err (!%p279_p1)
}
  0x21   :  { %s313_s0 = smov 128   ;;  %s314_s7 = smov 8  }
  0x22   :  { %32 = dma.hbm_to_vmem [thread:$0]  %s386_s1, 2048, %s339_s15, [#allocation6], %s313_s0, %s313_s0, %s314_s7  }
  0x23   :  { %305 = dma.done.wait [#allocation3], 128  }
  0x24   :  { %306 = vsyncadd [#allocation3], 4294967168 }
  0x25   :  { %307 = dma.done.wait [#allocation6], 2048  }
  0x26   :  { %308 = vsyncadd [#allocation6], 4294965248  ;;  %v315_v0 = vmov 0.0|0.0   ;;  %vm316_vm0 = vmmov 0   ;;  %v317_v1 = vmov 0.0   ;;  %v42_v2 = vld [vmem:[#allocation5] sm:$0xff] }
  0x27   :  { %207 = vmatprep.subr.bf16.mxu0 %v315_v0  ;;  %204 = vmatprep.mubr.msk.f32.mxu0 %vm316_vm0, %v317_v1  ;;  %v43_v3 = vld [vmem:[#allocation5 + $0x8] sm:$0xff]  ;;  %v44_v5 = vld [vmem:[#allocation5 + $0x10] sm:$0xff]  ;;  %v45_v6 = vld [vmem:[#allocation5 + $0x18] sm:$0xff]  ;;  %s318_s11 = smov [#allocation7]  }
  0x28   :  { %v208_v4 = vpack.c.bf16 %v43_v3, %v42_v2  ;;  %v211_v7 = vpack.c.bf16 %v45_v6, %v44_v5  ;;  %v46_v8 = vld [vmem:[#allocation5 + $0x20] sm:$0xff]  ;;  %v47_v9 = vld [vmem:[#allocation5 + $0x28] sm:$0xff]  ;;  %v48_v11 = vld [vmem:[#allocation5 + $0x30] sm:$0xff]  ;;  %s144_s12 = sshll.u32 %s318_s11, 4  ;;  %s145_s12 = int_to_ptr.vmem [resolvable:$true] %s144_s12 }
  0x29   :  { %v214_v10 = vpack.c.bf16 %v47_v9, %v46_v8  ;;  %v49_v12 = vld [vmem:[#allocation5 + $0x38] sm:$0xff]  ;;  %v50_v14 = vld [vmem:[#allocation5 + $0x40] sm:$0xff]  ;;  %v51_v15 = vld [vmem:[#allocation5 + $0x48] sm:$0xff]  ;;  %s283_s13 = scalar_lea.vmem %s145_s12, 128  ;;  %p288_p3 = scmp.lt.s32.totalorder %s145_s12, %s145_s12 }
  0x2a   :  { %209 = vmatpush3.bf16.xpose.msra.mxu0 %v208_v4  ;;  %v217_v13 = vpack.c.bf16 %v49_v12, %v48_v11  ;;  %v220_v16 = vpack.c.bf16 %v51_v15, %v50_v14  ;;  %v52_v17 = vld [vmem:[#allocation5 + $0x50] sm:$0xff]  ;;  %v53_v18 = vld [vmem:[#allocation5 + $0x58] sm:$0xff]  ;;  %v54_v20 = vld [vmem:[#allocation5 + $0x60] sm:$0xff]  ;;  %p284_p2 = scmp.ne.s32.totalorder %s145_s12, %s283_s13  ;;  %p289_p4 = scmp.lt.s32.totalorder %s283_s13, %s283_s13 }
  0x2b   :  { %210 = vmatprep.subr.bf16.mxu0 %v315_v0  ;;  %v223_v19 = vpack.c.bf16 %v53_v18, %v52_v17  ;;  %v55_v21 = vld [vmem:[#allocation5 + $0x68] sm:$0xff]  ;;  %v56_v23 = vld [vmem:[#allocation5 + $0x70] sm:$0xff]  ;;  %v57_v24 = vld [vmem:[#allocation5 + $0x78] sm:$0xff] }
  0x2c   :  { %v226_v22 = vpack.c.bf16 %v55_v21, %v54_v20  ;;  %v229_v25 = vpack.c.bf16 %v57_v24, %v56_v23  ;;  %v41_v26 = vld [vmem:[#allocation2] sm:$0xff]  ;;  %p290_p5 = por %p289_p4, %p288_p3 }
  0x2d   :  { %v154_v27 = vld [vmem:[%s387_s2] ss:$0 sm:$0xff] }
  0x2e   :  { %p291_p6 = pnand %p290_p5, %p284_p2 }
  0x32   :  { %212 = vmatpush3.bf16.xpose.msra.mxu0 %v211_v7 }
  0x33   :  { %213 = vmatprep.subr.bf16.mxu0 %v315_v0 }
  0x3a   :  { %215 = vmatpush3.bf16.xpose.msra.mxu0 %v214_v10 }
  0x3b   :  { %216 = vmatprep.subr.bf16.mxu0 %v315_v0 }
  0x42   :  { %218 = vmatpush3.bf16.xpose.msra.mxu0 %v217_v13 }
  0x43   :  { %219 = vmatprep.subr.bf16.mxu0 %v315_v0 }
  0x4a   :  { %221 = vmatpush3.bf16.xpose.msra.mxu0 %v220_v16 }
  0x4b   :  { %222 = vmatprep.subr.bf16.mxu0 %v315_v0 }
  0x52   :  { %224 = vmatpush3.bf16.xpose.msra.mxu0 %v223_v19 }
  0x53   :  { %225 = vmatprep.subr.bf16.mxu0 %v315_v0 }
  0x5a   :  { %227 = vmatpush3.bf16.xpose.msra.mxu0 %v226_v22 }
  0x5b   :  { %228 = vmatprep.subr.bf16.mxu0 %v315_v0 }
  0x62   :  { %230 = vmatpush3.bf16.xpose.msra.mxu0 %v229_v25 }
  0x69   :  { %205 = vmatmul.mubr.f32.vlgmr.msra.gmra.mrb[0].mxu0 %v41_v26 }
 0x13c   :  { %v131_v28 = vpop.f32.mrb[0].mxu0 }
 0x13d   :  { %v132_v29 = vadd.f32 %v154_v27, %v131_v28  ;;  %v206_v30 = vpop.f32.mrb[1].mxu0 }
 0x13f   :  { %v135_v31 = vmax.f32 %v132_v29, 0.0 }
 0x141   :  { %v136_v32 = vadd.f32 %v135_v31, %v41_v26 }
 0x143   :  { %137 = vst [vmem:[#allocation7] sm:$0xff] %v136_v32 }
 0x144   :  { %294 = shalt.err (!%p291_p6)
}
 0x145   :  { %s295_s2 = scalar_lea.hbm %s388_s3, 128 }
 0x146   :  { %p296_p7 = scmp.ne.s32.totalorder %s388_s3, %s295_s2  ;;  %p299_p8 = scmp.lt.u32.totalorder %s295_s2, %s388_s3 }
 0x148   :  { %p301_p9 = pnand %p299_p8, %p296_p7 }
 0x14a   :  { %304 = shalt.err (!%p301_p9)
}
 0x14b   :  { %147 = dma.vmem_to_hbm [thread:$0]  %s145_s12, 128, %s388_s3, [#allocation4]  }
 0x14c   :  { %309 = dma.done.wait [#allocation4], 128  }
 0x14d   :  { %310 = vsyncadd [#allocation4], 4294967168 }
 0x14e   :  { %151 = vsyncpa [#allocation3], 1 }
 0x14f   :  { %152 = vsyncpa [#allocation6], 1 }
 0x150   :  { %153 = vsyncpa [#allocation4], 1 }

</bundles_post_ra>
